<compile_context>
chip_gen: v7x
topology: tpu7x:2x2x1
jax: 0.10.0
libtpu: 0.0.40
codegen_flags: <defaults>
</compile_context>

<pallas_src>
import jax
import jax.numpy as jnp
from jax.experimental import pallas as pl
from jax.experimental.pallas import tpu as pltpu


# ---------------------------------------------------------------------------
# helpers
# ---------------------------------------------------------------------------

def _round_up(x: int, n: int) -> int:
    return ((x + n - 1) // n) * n


_VMEM_TABLE_BUDGET_BYTES = 40 * 1024 * 1024   # conservative vs. v7x 64 MiB VMEM
_ONEHOT_MAX_ROWS = 4096                       # cap one-hot MXU cost
_VMEM_LIMIT_BYTES = 48 * 1024 * 1024          # > scoped defaults, < v7x physical


# ---------------------------------------------------------------------------
# Path A: VMEM-resident table + one-hot MXU gather (small tables)
# ---------------------------------------------------------------------------

def _onehot_gather_kernel(idx_ref, w_ref, o_ref):
    # idx_ref: (TM, 1) int32   w_ref: (V, d) resident in VMEM   o_ref: (TM, d)
    idx = idx_ref[...]                                    # (TM, 1)
    tm = idx.shape[0]
    v = w_ref.shape[0]
    iota = jax.lax.broadcasted_iota(jnp.int32, (tm, v), 1)
    onehot = (iota == idx).astype(w_ref.dtype)            # (TM, V) exact 0/1
    o_ref[...] = jnp.dot(
        onehot,
        w_ref[...],
        precision=jax.lax.Precision.HIGHEST,              # keep f32 exact
        preferred_element_type=jnp.float32,
    ).astype(o_ref.dtype)


def _onehot_gather(weight: jax.Array, idx: jax.Array, tm: int) -> jax.Array:
    v, d = weight.shape
    m_pad = idx.shape[0]
    n_tiles = m_pad // tm
    itemsize = weight.dtype.itemsize
    cost = pl.CostEstimate(
        flops=2 * m_pad * v * d,
        transcendentals=0,
        bytes_accessed=v * d * itemsize + m_pad * 4 + m_pad * d * itemsize,
    )
    idx2 = idx.reshape(m_pad, 1)
    return pl.pallas_call(
        _onehot_gather_kernel,
        out_shape=jax.ShapeDtypeStruct((m_pad, d), weight.dtype),
        grid=(n_tiles,),
        in_specs=[
            pl.BlockSpec((tm, 1), lambda i: (i, 0)),      # index tile
            pl.BlockSpec((v, d), lambda i: (0, 0)),       # table resident in VMEM
        ],
        out_specs=pl.BlockSpec((tm, d), lambda i: (i, 0)),
        compiler_params=pltpu.CompilerParams(
            dimension_semantics=("parallel",),
            vmem_limit_bytes=_VMEM_LIMIT_BYTES,
        ),
        cost_estimate=cost,
    )(idx2, weight)


# ---------------------------------------------------------------------------
# Path B: HBM table + batched per-row DMA gather with cross-step prefetch
# ---------------------------------------------------------------------------

def _dma_gather_kernel(idx_ref, w_hbm, o_ref, buf, sem):
    # idx_ref: (m_pad,) int32 in SMEM (scalar prefetch)
    # w_hbm  : (V, d) raw HBM ref (memory_space=pl.ANY)
    # o_ref  : (TM, d) output tile in VMEM (pipelined writeback)
    # buf    : (2, TM, d) VMEM scratch (double buffer), sem: DMA sem array (2,)
    i = pl.program_id(0)
    n = pl.num_programs(0)
    tm = o_ref.shape[0]

    def issue(tile, slot):
        base = tile * tm

        # Issue all TM row copies so they are concurrently in flight.
        @pl.loop(0, tm)
        def _(r):
            row = idx_ref[base + r]
            pltpu.make_async_copy(
                w_hbm.at[pl.ds(row, 1), :],
                buf.at[slot, pl.ds(r, 1), :],
                sem.at[slot],
            ).start()

    cur = i & 1

    # Prime the pipeline on the very first grid step.
    @pl.when(i == 0)
    def _():
        issue(0, 0)

    # Prefetch the next tile's rows into the other slot *before* waiting on
    # the current tile, so gather DMAs of consecutive tiles overlap.
    @pl.when(i + 1 < n)
    def _():
        issue(i + 1, 1 - cur)

    # Aggregate wait: the TM row copies into slot `cur` signal sem[cur] by a
    # total of tm*d*itemsize bytes, exactly the size of buf[cur].
    pltpu.make_async_copy(buf.at[cur], buf.at[cur], sem.at[cur]).wait()

    # Dense, lane-aligned (TM, d) store into the pipelined output tile.
    o_ref[...] = buf[cur]


def _dma_gather(weight: jax.Array, idx: jax.Array, tm: int) -> jax.Array:
    v, d = weight.shape
    m_pad = idx.shape[0]
    n_tiles = m_pad // tm
    itemsize = weight.dtype.itemsize
    cost = pl.CostEstimate(
        flops=0,
        transcendentals=0,
        bytes_accessed=2 * m_pad * d * itemsize + m_pad * 4,
    )
    grid_spec = pltpu.PrefetchScalarGridSpec(
        num_scalar_prefetch=1,                    # indices prefetched to SMEM
        grid=(n_tiles,),
        in_specs=[pl.BlockSpec(memory_space=pl.ANY)],   # table stays in HBM
        out_specs=pl.BlockSpec((tm, d), lambda i, idx_sm: (i, 0)),
        scratch_shapes=[
            pltpu.VMEM((2, tm, d), weight.dtype),
            pltpu.SemaphoreType.DMA((2,)),
        ],
    )
    return pl.pallas_call(
        _dma_gather_kernel,
        out_shape=jax.ShapeDtypeStruct((m_pad, d), weight.dtype),
        grid_spec=grid_spec,
        compiler_params=pltpu.CompilerParams(
            # Cross-step prefetch carries state between grid steps -> must be
            # sequential ("arbitrary"), not megacore-sharded.
            dimension_semantics=("arbitrary",),
            vmem_limit_bytes=_VMEM_LIMIT_BYTES,
        ),
        cost_estimate=cost,
    )(idx, weight)


# ---------------------------------------------------------------------------
# Public forward
# ---------------------------------------------------------------------------

def embedding_forward(
    weight: jax.Array,
    indices: jax.Array | None,
    *,
    tile_m: int = 256,
    force_path: str | None = None,   # None | "resident" | "dma" (for testing)
) -> jax.Array:
    """Pallas equivalent of pykeen Embedding.forward.

    weight:  (num_embeddings, embedding_dim)
    indices: (m,) integer indices, or None (returns the full table).
    """
    if indices is None:
        # "return all representations" — pure parameter passthrough.
        return weight

    assert indices.ndim == 1, "indices must have shape (m,)"
    v, d = weight.shape
    m = indices.shape[0]

    # Clamp (torch would raise on OOB; clamping avoids undefined DMAs) and
    # narrow to int32 for SMEM / VMEM index tiles.
    idx = jnp.clip(indices.astype(jnp.int32), 0, v - 1)

    # Tile size: multiple of 8 sublanes (f32), default 256; pad m up to it.
    tm = min(tile_m, _round_up(max(m, 1), 8))
    tm = _round_up(tm, 8)
    m_pad = _round_up(m, tm)
    if m_pad > m:
        idx = jnp.pad(idx, (0, m_pad - m))       # pad with valid index 0

    table_bytes = v * d * weight.dtype.itemsize
    use_resident = (table_bytes <= _VMEM_TABLE_BUDGET_BYTES) and (v <= _ONEHOT_MAX_ROWS)
    if force_path == "resident":
        use_resident = True
    elif force_path == "dma":
        use_resident = False

    out = _onehot_gather(weight, idx, tm) if use_resident else _dma_gather(weight, idx, tm)
    return out[:m] if m_pad > m else out


# ---------------------------------------------------------------------------
# demo / self-check
# ---------------------------------------------------------------------------

if __name__ == "__main__":
    num_embeddings = 64
    embedding_dim = 128     # lane-dense last dim
    m = 300                 # pads to 512 -> 2 tiles of TM=256

    key = jax.random.PRNGKey(0)
    k_w, k_i = jax.random.split(key)

    # Deterministic init matching torch default initializer nn.init.normal_.
    weight = jax.random.normal(k_w, (num_embeddings, embedding_dim), dtype=jnp.float32)
    indices = jax.random.randint(k_i, (m,), 0, num_embeddings, dtype=jnp.int32)

    ref = jnp.take(weight, indices, axis=0)

    # Path A: VMEM-resident table + one-hot MXU gather (small tables).
    out_a = jax.block_until_ready(embedding_forward(weight, indices, force_path="resident"))
    assert out_a.shape == (m, embedding_dim) and out_a.dtype == jnp.float32
    assert bool(jnp.allclose(out_a, ref, rtol=2e-6, atol=2e-6)), "resident path mismatch"

    # Path B: batched per-row DMA gather with cross-step prefetch — bit-exact copy.
    out_b = jax.block_until_ready(embedding_forward(weight, indices, force_path="dma"))
    assert out_b.shape == (m, embedding_dim) and out_b.dtype == jnp.float32
    assert bool(jnp.array_equal(out_b, ref)), "dma path mismatch"

    # Auto path selection (small table -> resident).
    out_auto = jax.block_until_ready(embedding_forward(weight, indices))
    assert bool(jnp.allclose(out_auto, ref, rtol=2e-6, atol=2e-6))

    # forward(None): all representations.
    all_out = jax.block_until_ready(embedding_forward(weight, None))
    assert all_out.shape == (num_embeddings, embedding_dim)

    print("KERNEL_OK")
</pallas_src>

<mosaic_0001>
module attributes {stable_mosaic.version = 11 : i64} {
  func.func @_onehot_gather_kernel(%arg0: i32, %arg1: memref<256x1xi32, #tpu.memory_space<vmem>>, %arg2: memref<64x128xf32, #tpu.memory_space<vmem>>, %arg3: memref<256x128xf32, #tpu.memory_space<vmem>>) attributes {dimension_semantics = [#tpu.dimension_semantics<parallel>], iteration_bounds = array<i64: 2>, scalar_prefetch = 0 : i64, scratch_operands = 0 : i64, tpu.core_type = #tpu.core_type<tc>, window_params = [{transform_indices = @transform_0, window_bounds = array<i64: 256, 1>}, {pipeline_mode = #tpu.pipeline_mode<synchronous>, transform_indices = @transform_1, window_bounds = array<i64: 64, 128>}, {transform_indices = @transform_2, window_bounds = array<i64: 256, 128>}]} {
    %c0 = arith.constant 0 : index
    %c0_0 = arith.constant 0 : index
    %0 = vector.load %arg1[%c0, %c0_0] : memref<256x1xi32, #tpu.memory_space<vmem>>, vector<256x1xi32>
    %1 = tpu.iota {dimensions = array<i32: 1>} : vector<256x64xi32>
    %2 = vector.broadcast %0 : vector<256x1xi32> to vector<256x64xi32>
    %3 = arith.cmpi eq, %1, %2 : vector<256x64xi32>
    %4 = arith.extui %3 : vector<256x64xi1> to vector<256x64xi32>
    %5 = arith.sitofp %4 : vector<256x64xi32> to vector<256x64xf32>
    %c0_1 = arith.constant 0 : index
    %c0_2 = arith.constant 0 : index
    %6 = vector.load %arg2[%c0_1, %c0_2] : memref<64x128xf32, #tpu.memory_space<vmem>>, vector<64x128xf32>
    %cst = arith.constant dense<0.000000e+00> : vector<256x128xf32>
    %7 = tpu.matmul %5, %6, %cst {dimension_numbers = #tpu.dot_dimension_numbers<[1], [0], [0], [1], [0, 0, 1, 1], [], []>, precision = #tpu.contract_precision<fp32>} : vector<256x64xf32>, vector<64x128xf32>, vector<256x128xf32> -> vector<256x128xf32>
    %c0_3 = arith.constant 0 : index
    %c0_4 = arith.constant 0 : index
    %8 = vector.load %arg3[%c0_3, %c0_4] : memref<256x128xf32, #tpu.memory_space<vmem>>, vector<256x128xf32>
    tpu.vector_store %arg3[%c0_3, %c0_4], %7 {strides = array<i32>} : memref<256x128xf32, #tpu.memory_space<vmem>>, vector<256x128xf32>,
    return
  }
  func.func @transform_0(%arg0: i32) -> (i32, i32) {
    %c0_i32 = arith.constant 0 : i32
    %c0_i32_0 = arith.constant 0 : i32
    return %arg0, %c0_i32 : i32, i32
  }
  func.func @transform_1(%arg0: i32) -> (i32, i32) {
    %c0_i32 = arith.constant 0 : i32
    %c0_i32_0 = arith.constant 0 : i32
    %c0_i32_1 = arith.constant 0 : i32
    return %c0_i32, %c0_i32_0 : i32, i32
  }
  func.func @transform_2(%arg0: i32) -> (i32, i32) {
    %c0_i32 = arith.constant 0 : i32
    %c0_i32_0 = arith.constant 0 : i32
    return %arg0, %c0_i32 : i32, i32
  }
}

</mosaic_0001>

<bundles_post_ra>
// kernel: tpu_custom_call.1
= control target key start
LH: loop header
LB: loop body
LE: loop exit
PB: predicated region body
PF: predicated region fallthrough
CT: control target
= control target key end

     0   :  { %7 = vsyncpa [#allocation3], 0  ;;  %s4487_s0 = inlined_call_operand.vmem [shape: s32[512,1], index: 0, kind: input, shape index: {}]   ;;  %s4488_s1 = inlined_call_operand.vmem [shape: f32[64,128], index: 1, kind: input, shape index: {}]   ;;  %s4489_s2 = inlined_call_operand.hbm [shape: f32[512,128], index: 2, kind: output, shape index: {}]  }
   0x1   :  { %9 = vsyncpa [#allocation3 + $0x1], 0  ;;  %s3604_s9 = smov 0   ;;  %s3606_s10 = smov 0  }
   0x2   :  { %s3608_s11 = smov 0   ;;  %s3610_s12 = smov 0  }
   0x3 LB: > { %s3625_s13 = sadd.s32 4294967295, %s3582_s12   ;;  %s2454_s14 = sadd.s32 4294967294, %s3582_s12   ;;  %s3582_s12 = sphi %s3610_s12, %s4564_s12   ;;  %s3578_s11 = sphi %s3608_s11, %s4563_s11   ;;  %s3574_s10 = sphi %s3606_s10, %s4562_s10   ;;  %s3570_s9 = sphi %s3604_s9, %s4561_s9  }
   0x4   : > { %s3629_s15 = sadd.s32 1, %s3582_s12   ;;  %s69_s16 = sadd.s32 1, %s3578_s11 }
   0x5   : > { %s66_s17 = ssub.s32 %s3582_s12, %s3629_s15  ;;  %p79_p0 = scmp.ne.s32.totalorder %s3578_s11, %s3574_s10 }
   0x6   : > { %p67_p1 = scmp.eq.s32.totalorder %s66_s17, 0  ;;  %p80_p2 = scmp.eq.s32.totalorder %s3625_s13, 1 }
   0x7   : > { %p85_p3 = scmp.ne.s32.totalorder %s3574_s10, %s3570_s9  ;;  %p86_p4 = scmp.eq.s32.totalorder %s2454_s14, 1 }
   0x8   : > { %s3640_s18 = scalar_select %p67_p1, %s3578_s11, %s69_s16  }
   0x9   : > { %p3642_p5 = por %p80_p2, %p79_p0  ;;  %p3646_p6 = por %p86_p4, %p85_p3 }
   0xa   : > { %p2457_p7 = scmp.ge.s32.totalorder %s3582_s12, 1  ;;  %p116_p8 = scmp.lt.s32.totalorder %s3582_s12, 3 }
   0xc   : > { %p117_p9 = pnand %p2457_p7, %p116_p8 }
   0xe   : > { %120 = sbr.rel (%p117_p9) target bundleno = 590 (0x24e), region = 28 }
  0x15   : > { %s2459_s21 = sshll.u32 %s3625_s13, 5  ;;  %v371_v0 = vld [vmem:[%s4488_s1] sm:$0xff]  ;;  %v372_v1 = vld [vmem:[%s4488_s1 + $0x8] sm:$0xff]  ;;  %v3662_v2 = vld [vmem:[%s4488_s1 + $0x10] sm:$0xff]  ;;  %v3584_v3 = vmov 0   ;;  %vm379_vm0 = vcmask 523264  }
  0x16   : > { %3519 = vset.pattern.permute.xlu1 %v3584_v3  ;;  %3518 = vset.pattern.permute.xlu0 %v3584_v3  ;;  %p139_p10 = scmp.lt.s32.totalorder %s2459_s21, 63  ;;  %v477_v4 = vand.u32 4294901760, %v371_v0  ;;  %v480_v5 = vand.u32 4294901760, %v372_v1  ;;  %v3667_v6 = vld [vmem:[%s4488_s1 + $0x18] sm:$0xff]  ;;  %v483_v7 = vand.u32 4294901760, %v3662_v2  ;;  %v3691_v11 = vld [vmem:[%s4488_s1 + $0x20] sm:$0xff] }
  0x17   : > { %v486_v8 = vand.u32 4294901760, %v3667_v6  ;;  %v3696_v12 = vld [vmem:[%s4488_s1 + $0x28] sm:$0xff]  ;;  %v489_v15 = vand.u32 4294901760, %v3691_v11  ;;  %v3725_v24 = vld [vmem:[%s4488_s1 + $0x30] sm:$0xff]  ;;  %v3730_v25 = vld [vmem:[%s4488_s1 + $0x38] sm:$0xff]  ;;  %s135_s23 = sand.u32 1, %s3574_s10  }
  0x18   : > { %s4566_s21 = smov (!%p139_p10, %s2459_s21), 63  ;;  %v3671_v9 = vpack.c.bf16 %v480_v5, %v477_v4  ;;  %v492_v16 = vand.u32 4294901760, %v3696_v12  ;;  %v495_v26 = vand.u32 4294901760, %v3725_v24  ;;  %v498_v27 = vand.u32 4294901760, %v3730_v25  ;;  %s2458_s24 = sshll.u32 %s135_s23, 8 }
  0x19   : > { %v3677_v10 = vpack.c.bf16 %v486_v8, %v483_v7  ;;  %s2460_s30 = sshll.u32 %s4566_s21, 3  ;;  %v3744_v31 = vsub.f32 %v371_v0, %v477_v4  ;;  %v3746_v32 = vsub.f32 %v372_v1, %v480_v5  ;;  %v885_v49 = vsub.f32 %v3662_v2, %v483_v7  ;;  %s4401_s25 = scalar_lea.vmem [#allocation2], %s2458_s24 }
  0x1a   : > { %3268 = vmatprep.subr.bf16.mxu0 %v3671_v9  ;;  %3220 = vmatprep.subr.bf16.mxu1 %v3671_v9  ;;  %s3684_s5 = scalar_lea.vmem %s4487_s0, %s2460_s30  ;;  %v3710_v19 = vpack.c.bf16 %v492_v16, %v489_v15  ;;  %v3740_v30 = vpack.c.bf16 %v498_v27, %v495_v26  ;;  %v892_v50 = vsub.f32 %v3667_v6, %v486_v8  ;;  %s2594_s26 = sshll.u32 %s3625_s13, 12 }
  0x1b   : > { %3270 = vmatpush3.bf16.msra.mxu0 %v3671_v9  ;;  %3222 = vmatpush3.bf16.msra.mxu1 %v3671_v9  ;;  %v147_v13 = vld [vmem:[%s3684_s5 + $0x10] sm:$0xff]  ;;  %v145_v14 = vld [vmem:[%s3684_s5] sm:$0xff]  ;;  %v148_v17 = vld [vmem:[%s3684_s5 + $0x18] sm:$0xff]  ;;  %v872_v35 = vand.u32 4294901760, %v3744_v31  ;;  %v879_v36 = vand.u32 4294901760, %v3746_v32  ;;  %v886_v53 = vand.u32 4294901760, %v885_v49  ;;  %v899_v3 = vsub.f32 %v3691_v11, %v489_v15  ;;  %s4438_s30 = scalar_lea.hbm %s4489_s2, %s2594_s26 }
  0x1c   : > { %3272 = vmatprep.subr.bf16.mxu0 %v3677_v10  ;;  %3224 = vmatprep.subr.bf16.mxu1 %v3677_v10  ;;  %v146_v18 = vld [vmem:[%s3684_s5 + $0x8] sm:$0xff]  ;;  %v149_v21 = vld [vmem:[%s3684_s5 + $0x20] sm:$0xff]  ;;  %v152_v22 = vld [vmem:[%s3684_s5 + $0x38] sm:$0xff]  ;;  %v893_v54 = vand.u32 4294901760, %v892_v50  ;;  %v906_v4 = vsub.f32 %v3696_v12, %v492_v16  ;;  %s2392_s27 = sshll.u32 %s4401_s25, 4  ;;  %s4446_s13 = scalar_lea.sflag [#allocation3], %s135_s23  ;;  %s4440_s27 = int_to_ptr.vmem [resolvable:$true] %s2392_s27 }
  0x1d   : > { %186 = vperm.xlu1 %3519, %v147_v13   ;;  %180 = vperm.xlu0 %3518, %v145_v14   ;;  %v150_v20 = vld [vmem:[%s3684_s5 + $0x28] sm:$0xff]  ;;  %v151_v23 = vld [vmem:[%s3684_s5 + $0x30] sm:$0xff]  ;;  %v153_v29 = vld [vmem:[%s3684_s5 + $0x40] sm:$0xff]  ;;  %v873_v37 = vsub.f32 %v3744_v31, %v872_v35  ;;  %v880_v38 = vsub.f32 %v3746_v32, %v879_v36  ;;  %v3756_v39 = vpack.c.bf16 %v879_v36, %v872_v35  ;;  %v900_v7 = vand.u32 4294901760, %v899_v3  ;;  %s3520_s3 = scalar_lea.vmem %s4440_s27, 4096  ;;  %s3586_s4 = smov [#allocation2]  }
  0x1e   : > { %v154_v28 = vld [vmem:[%s3684_s5 + $0x48] sm:$0xff]  ;;  %v156_v33 = vld [vmem:[%s3684_s5 + $0x58] sm:$0xff]  ;;  %v155_v34 = vld [vmem:[%s3684_s5 + $0x50] sm:$0xff]  ;;  %v887_v55 = vsub.f32 %v885_v49, %v886_v53  ;;  %v894_v56 = vsub.f32 %v892_v50, %v893_v54  ;;  %v3776_v57 = vpack.c.bf16 %v893_v54, %v886_v53  ;;  %v907_v8 = vand.u32 4294901760, %v906_v4  ;;  %p3521_p11 = scmp.ne.s32.totalorder %s4440_s27, %s3520_s3 }
  0x1f   : > { %3274 = vmatpush3.bf16.msra.mxu0 %v3677_v10  ;;  %3226 = vmatpush3.bf16.msra.mxu1 %v3677_v10  ;;  %v158_v40 = vld [vmem:[%s3684_s5 + $0x68] sm:$0xff]  ;;  %v157_v41 = vld [vmem:[%s3684_s5 + $0x60] sm:$0xff]  ;;  %v874_v42 = vand.u32 4294901760, %v873_v37  ;;  %v881_v43 = vand.u32 4294901760, %v880_v38  ;;  %v160_v45 = vld [vmem:[%s3684_s5 + $0x78] sm:$0xff]  ;;  %v901_v13 = vsub.f32 %v899_v3, %v900_v7 }
  0x20   : > { %3276 = vmatprep.subr.bf16.mxu0 %v3710_v19  ;;  %3228 = vmatprep.subr.bf16.mxu1 %v3710_v19  ;;  %v159_v46 = vld [vmem:[%s3684_s5 + $0x70] sm:$0xff]  ;;  %v162_v47 = vld [vmem:[%s3684_s5 + $0x88] sm:$0xff]  ;;  %v161_v48 = vld [vmem:[%s3684_s5 + $0x80] sm:$0xff]  ;;  %v888_v60 = vand.u32 4294901760, %v887_v55  ;;  %v895_v61 = vand.u32 4294901760, %v894_v56  ;;  %v908_v14 = vsub.f32 %v906_v4, %v907_v8  ;;  %p3522_p12 = pnand %p3521_p11, %p3642_p5 }
  0x21   : > { %189 = vperm.xlu1 %3519, %v148_v17   ;;  %183 = vperm.xlu0 %3518, %v146_v18   ;;  %v3761_v44 = vpack.c.bf16 %v881_v43, %v874_v42  ;;  %v164_v51 = vld [vmem:[%s3684_s5 + $0x98] sm:$0xff]  ;;  %v163_v52 = vld [vmem:[%s3684_s5 + $0x90] sm:$0xff]  ;;  %v166_v58 = vld [vmem:[%s3684_s5 + $0xa8] sm:$0xff]  ;;  %v3794_v17 = vpack.c.bf16 %v907_v8, %v900_v7  ;;  %v902_v15 = vand.u32 4294901760, %v901_v13 }
  0x22   : > { %v165_v59 = vld [vmem:[%s3684_s5 + $0xa0] sm:$0xff]  ;;  %v3780_v62 = vpack.c.bf16 %v895_v61, %v888_v60  ;;  %v168_v63 = vld [vmem:[%s3684_s5 + $0xb8] sm:$0xff]  ;;  %v167_v0 = vld [vmem:[%s3684_s5 + $0xb0] sm:$0xff]  ;;  %p3523_p13 = pneg %p3522_p12 }
  0x23   : > { %3278 = vmatpush3.bf16.msra.mxu0 %v3710_v19  ;;  %3230 = vmatpush3.bf16.msra.mxu1 %v3710_v19  ;;  %v170_v1 = vld [vmem:[%s3684_s5 + $0xc8] sm:$0xff]  ;;  %v169_v2 = vld [vmem:[%s3684_s5 + $0xc0] sm:$0xff]  ;;  %v172_v5 = vld [vmem:[%s3684_s5 + $0xd8] sm:$0xff] }
  0x24   : > { %3280 = vmatprep.subr.bf16.mxu0 %v3740_v30  ;;  %3232 = vmatprep.subr.bf16.mxu1 %v3740_v30  ;;  %v171_v6 = vld [vmem:[%s3684_s5 + $0xd0] sm:$0xff]  ;;  %v174_v18 = vld [vmem:[%s3684_s5 + $0xe8] sm:$0xff]  ;;  %v173_v11 = vld [vmem:[%s3684_s5 + $0xe0] sm:$0xff] }
  0x25   : > { %195 = vperm.xlu1 %3519, %v150_v20   ;;  %192 = vperm.xlu0 %3518, %v149_v21   ;;  %v909_v20 = vand.u32 4294901760, %v908_v14  ;;  %v176_v12 = vld [vmem:[%s3684_s5 + $0xf8] sm:$0xff]  ;;  %v175_v16 = vld [vmem:[%s3684_s5 + $0xf0] sm:$0xff]  ;;  %s3524_s5 = sshll.u32 %s3586_s4, 4  ;;  %s3525_s5 = int_to_ptr.vmem [resolvable:$false] %s3524_s5 }
  0x26   : > { %s3526_s6 = scalar_lea.vmem %s3525_s5, 8192  ;;  %p3527_p0 = scmp.lt.s32.totalorder %s4440_s27, %s3525_s5 }
  0x27   : > { %3282 = vmatpush3.bf16.msra.mxu0 %v3740_v30  ;;  %3234 = vmatpush3.bf16.msra.mxu1 %v3740_v30  ;;  %v3798_v21 = vpack.c.bf16 %v909_v20, %v902_v15  ;;  %p3528_p1 = scmp.lt.s32.totalorder %s3526_s6, %s3520_s3 }
  0x28   : > { %3284 = vmatprep.subr.bf16.mxu0 %v3756_v39  ;;  %3236 = vmatprep.subr.bf16.mxu1 %v3761_v44 }
  0x29   : > { %201 = vperm.xlu1 %3519, %v152_v22   ;;  %198 = vperm.xlu0 %3518, %v151_v23   ;;  %v913_v22 = vsub.f32 %v3725_v24, %v495_v26  ;;  %v920_v23 = vsub.f32 %v3730_v25, %v498_v27  ;;  %v3818_v24 = vpack.c.bf16 %v906_v4, %v899_v3  ;;  %v177_v26 = vlaneseq  ;;  %p3529_p2 = por %p3528_p1, %p3527_p0 }
  0x2b   : > { %v3820_v25 = vand.u32 127, %v177_v26  ;;  %v3822_v27 = vpack.c.bf16 %v920_v23, %v913_v22  ;;  %p3530_p3 = pnand %p3529_p2, %p3523_p13 }
  0x2d   : > { %207 = vperm.xlu1 %3519, %v154_v28   ;;  %204 = vperm.xlu0 %3518, %v153_v29   ;;  %v914_v28 = vand.u32 4294901760, %v913_v22  ;;  %v921_v29 = vand.u32 4294901760, %v920_v23 }
  0x2f   : > { %v3808_v35 = vpack.c.bf16 %v921_v29, %v914_v28 }
  0x31   : > { %213 = vperm.xlu1 %3519, %v156_v33   ;;  %210 = vperm.xlu0 %3518, %v155_v34   ;;  %v915_v33 = vsub.f32 %v913_v22, %v914_v28  ;;  %v922_v34 = vsub.f32 %v920_v23, %v921_v29 }
  0x33   : > { %v916_v36 = vand.u32 4294901760, %v915_v33  ;;  %v923_v37 = vand.u32 4294901760, %v922_v34 }
  0x35   : > { %219 = vperm.xlu1 %3519, %v158_v40   ;;  %216 = vperm.xlu0 %3518, %v157_v41   ;;  %v3810_v38 = vpack.c.bf16 %v923_v37, %v916_v36  ;;  %v3814_v40 = vpack.c.bf16 %v3746_v32, %v3744_v31  ;;  %v3816_v41 = vpack.c.bf16 %v892_v50, %v885_v49 }
  0x39   : > { %225 = vperm.xlu1 %3519, %v160_v45   ;;  %222 = vperm.xlu0 %3518, %v159_v46   ;;  %v4490_v45 = vmov 0.0  }
  0x3d   : > { %231 = vperm.xlu1 %3519, %v162_v47   ;;  %228 = vperm.xlu0 %3518, %v161_v48  }
  0x41   : > { %237 = vperm.xlu1 %3519, %v164_v51   ;;  %234 = vperm.xlu0 %3518, %v163_v52  }
  0x45   : > { %243 = vperm.xlu1 %3519, %v166_v58   ;;  %240 = vperm.xlu0 %3518, %v165_v59  }
  0x49   : > { %249 = vperm.xlu1 %3519, %v168_v63   ;;  %246 = vperm.xlu0 %3518, %v167_v0  }
  0x4d   : > { %255 = vperm.xlu1 %3519, %v170_v1   ;;  %252 = vperm.xlu0 %3518, %v169_v2  }
  0x51   : > { %261 = vperm.xlu1 %3519, %v172_v5   ;;  %258 = vperm.xlu0 %3518, %v171_v6  }
  0x55   : > { %267 = vperm.xlu1 %3519, %v174_v18   ;;  %264 = vperm.xlu0 %3518, %v173_v11  }
  0x59   : > { %273 = vperm.xlu1 %3519, %v176_v12   ;;  %270 = vperm.xlu0 %3518, %v175_v16  }
  0x9c   : > { %v187_v42 = vpop.permute.xlu1 %186  ;;  %v181_v43 = vpop.permute.xlu0 %180 }
  0x9d   : > { %vm277_vm1 = vcmp.eq.s32.totalorder %v3820_v25, %v187_v42  ;;  %vm275_vm2 = vcmp.eq.s32.totalorder %v3820_v25, %v181_v43 }
  0x9e   : > { %v3827_v31 = vsel %vm277_vm1, 1.0, %v4490_v45  ;;  %v3830_v32 = vsel %vm275_vm2, 1.0, %v4490_v45 }
  0x9f   : > { %v387_v46 = vsel %vm379_vm0, %v3827_v31, 0  ;;  %v381_v47 = vsel %vm379_vm0, %v3830_v32, 0 }
  0xa0   : > { %v3836_v48 = vsub.f32 %v387_v46, %v387_v46  ;;  %v3838_v49 = vsub.f32 %v381_v47, %v381_v47  ;;  %v190_v50 = vpop.permute.xlu1 %189  ;;  %v184_v51 = vpop.permute.xlu0 %183 }
  0xa1   : > { %vm278_vm3 = vcmp.eq.s32.totalorder %v3820_v25, %v190_v50  ;;  %vm276_vm4 = vcmp.eq.s32.totalorder %v3820_v25, %v184_v51 }
  0xa2   : > { %v3843_v52 = vsel %vm278_vm3, 1.0, %v4490_v45  ;;  %v3846_v53 = vsel %vm276_vm4, 1.0, %v4490_v45  ;;  %v551_v54 = vand.u32 4294901760, %v3838_v49  ;;  %v571_v58 = vand.u32 4294901760, %v3836_v48 }
  0xa3   : > { %v390_v55 = vsel %vm379_vm0, %v3843_v52, 0  ;;  %v384_v56 = vsel %vm379_vm0, %v3846_v53, 0 }
  0xa4   : > { %v3854_v59 = vsub.f32 %v390_v55, %v390_v55  ;;  %v3856_v60 = vsub.f32 %v384_v56, %v384_v56  ;;  %v196_v61 = vpop.permute.xlu1 %195  ;;  %3043 = vmatprep.mubr.f32.mxu0 %v551_v54  ;;  %v193_v63 = vpop.permute.xlu0 %192  ;;  %v552_v0 = vsub.f32 %v3838_v49, %v551_v54  ;;  %v572_v8 = vsub.f32 %v3836_v48, %v571_v58 }
  0xa5   : > { %vm280_vm5 = vcmp.eq.s32.totalorder %v3820_v25, %v196_v61  ;;  %vm279_vm6 = vcmp.eq.s32.totalorder %v3820_v25, %v193_v63 }
  0xa6   : > { %v3862_v1 = vsel %vm280_vm5, 1.0, %v4490_v45  ;;  %v3865_v2 = vsel %vm279_vm6, 1.0, %v4490_v45  ;;  %v553_v3 = vand.u32 4294901760, %v552_v0  ;;  %v561_v4 = vand.u32 4294901760, %v3856_v60 }
  0xa7   : > { %v396_v5 = vsel %vm379_vm0, %v3862_v1, 0  ;;  %v393_v6 = vsel %vm379_vm0, %v3865_v2, 0  ;;  %v581_v7 = vand.u32 4294901760, %v3854_v59 }
  0xa8   : > { %v3874_v13 = vsub.f32 %v396_v5, %v396_v5  ;;  %v3876_v14 = vsub.f32 %v393_v6, %v393_v6  ;;  %v202_v18 = vpop.permute.xlu1 %201  ;;  %2851 = vmatprep.mubr.f32.mxu1 %v553_v3  ;;  %3044 = vmatmul.mubr.f32.vlgmr.msra.gmra.mrb[0].mxu0 %v561_v4  ;;  %v199_v11 = vpop.permute.xlu0 %198  ;;  %v562_v15 = vsub.f32 %v3856_v60, %v561_v4 }
  0xa9   : > { %vm282_vm7 = vcmp.eq.s32.totalorder %v3820_v25, %v202_v18  ;;  %vm281_vm8 = vcmp.eq.s32.totalorder %v3820_v25, %v199_v11  ;;  %3046 = vmatprep.mubr.f32.mxu0 %v571_v58  ;;  %3286 = vmatpush3.bf16.msra.mxu0 %v3756_v39  ;;  %v582_v20 = vsub.f32 %v3854_v59, %v581_v7  ;;  %v573_v39 = vand.u32 4294901760, %v572_v8 }
  0xaa   : > { %v3884_v12 = vsel %vm282_vm7, 1.0, %v4490_v45  ;;  %v3887_v16 = vsel %vm281_vm8, 1.0, %v4490_v45  ;;  %v563_v22 = vand.u32 4294901760, %v562_v15  ;;  %v591_v23 = vand.u32 4294901760, %v3876_v14  ;;  %3288 = vmatprep.subr.bf16.mxu0 %v3776_v57 }
  0xab   : > { %v402_v28 = vsel %vm379_vm0, %v3884_v12, 0  ;;  %v399_v29 = vsel %vm379_vm0, %v3887_v16, 0  ;;  %v601_v33 = vand.u32 4294901760, %v3874_v13  ;;  %v583_v43 = vand.u32 4294901760, %v582_v20 }
  0xac   : > { %v3896_v34 = vsub.f32 %v402_v28, %v402_v28  ;;  %v3898_v36 = vsub.f32 %v399_v29, %v399_v29  ;;  %v208_v37 = vpop.permute.xlu1 %207  ;;  %2852 = vmatmul.mubr.f32.vlgmr.msra.gmra.mrb[0].mxu1 %v563_v22  ;;  %3047 = vmatmul.mubr.f32.gmra.mrb[2].mxu0 %v581_v7  ;;  %v205_v26 = vpop.permute.xlu0 %204  ;;  %v592_v42 = vsub.f32 %v3876_v14, %v591_v23 }
  0xad   : > { %vm284_vm9 = vcmp.eq.s32.totalorder %v3820_v25, %v208_v37  ;;  %3238 = vmatpush3.bf16.msra.mxu1 %v3761_v44  ;;  %vm283_vm10 = vcmp.eq.s32.totalorder %v3820_v25, %v205_v26  ;;  %2854 = vmatprep.mubr.f32.mxu1 %v573_v39  ;;  %v602_v46 = vsub.f32 %v3874_v13, %v601_v33 }
  0xae   : > { %4516 = vst [vmem:[#allocation5_spill] sm:$0xff] %v3896_v34  ;;  %4517 = vst [vmem:[#allocation6_spill] sm:$0xff] %v3898_v36  ;;  %v3906_v47 = vsel %vm284_vm9, 1.0, %v4490_v45  ;;  %v3909_v50 = vsel %vm283_vm10, 1.0, %v4490_v45  ;;  %3049 = vmatprep.mubr.f32.mxu0 %v591_v23  ;;  %v593_v51 = vand.u32 4294901760, %v592_v42  ;;  %v611_v54 = vand.u32 4294901760, %v3898_v36  ;;  %3240 = vmatprep.subr.bf16.mxu1 %v3780_v62 }
  0xaf   : > { %v408_v44 = vsel %vm379_vm0, %v3906_v47, 0  ;;  %v405_v55 = vsel %vm379_vm0, %v3909_v50, 0  ;;  %v621_v56 = vand.u32 4294901760, %v3896_v34  ;;  %3290 = vmatpush3.bf16.msra.mxu0 %v3776_v57  ;;  %v603_v4 = vand.u32 4294901760, %v602_v46 }
  0xb0   : > { %v3919_v58 = vsub.f32 %v408_v44, %v408_v44  ;;  %v3921_v61 = vsub.f32 %v405_v55, %v405_v55  ;;  %v214_v63 = vpop.permute.xlu1 %213  ;;  %2855 = vmatmul.mubr.f32.gmra.mrb[2].mxu1 %v583_v43  ;;  %3050 = vmatmul.mubr.f32.gmra.mrb[4].mxu0 %v601_v33  ;;  %v211_v0 = vpop.permute.xlu0 %210  ;;  %v612_v3 = vsub.f32 %v3898_v36, %v611_v54 }
  0xb1   : > { %vm286_vm11 = vcmp.eq.s32.totalorder %v3820_v25, %v214_v63  ;;  %vm285_vm12 = vcmp.eq.s32.totalorder %v3820_v25, %v211_v0  ;;  %2857 = vmatprep.mubr.f32.mxu1 %v593_v51  ;;  %3052 = vmatprep.mubr.f32.mxu0 %v611_v54  ;;  %v622_v5 = vsub.f32 %v3896_v34, %v621_v56 }
  0xb2   : > { %4518 = vst [vmem:[#allocation7_spill] sm:$0xff] %v3919_v58  ;;  %4519 = vst [vmem:[#allocation8_spill] sm:$0xff] %v3921_v61  ;;  %v3928_v57 = vsel %vm286_vm11, 1.0, %v4490_v45  ;;  %v3931_v6 = vsel %vm285_vm12, 1.0, %v4490_v45  ;;  %v613_v7 = vand.u32 4294901760, %v612_v3  ;;  %v631_v8 = vand.u32 4294901760, %v3921_v61  ;;  %3242 = vmatpush3.bf16.msra.mxu1 %v3780_v62  ;;  %3292 = vmatprep.subr.bf16.mxu0 %v3794_v17 }
  0xb3   : > { %v414_v18 = vsel %vm379_vm0, %v3928_v57, 0  ;;  %v411_v11 = vsel %vm379_vm0, %v3931_v6, 0  ;;  %v641_v15 = vand.u32 4294901760, %v3919_v58  ;;  %3244 = vmatprep.subr.bf16.mxu1 %v3798_v21  ;;  %3294 = vmatpush3.bf16.msra.mxu0 %v3794_v17  ;;  %v623_v29 = vand.u32 4294901760, %v622_v5 }
  0xb4   : > { %v3943_v20 = vsub.f32 %v414_v18, %v414_v18  ;;  %v3945_v22 = vsub.f32 %v411_v11, %v411_v11  ;;  %v220_v23 = vpop.permute.xlu1 %219  ;;  %2858 = vmatmul.mubr.f32.gmra.mrb[4].mxu1 %v603_v4  ;;  %3053 = vmatmul.mubr.f32.gmra.mrb[6].mxu0 %v621_v56  ;;  %v217_v62 = vpop.permute.xlu0 %216  ;;  %v632_v28 = vsub.f32 %v3921_v61, %v631_v8 }
  0xb5   : > { %vm288_vm13 = vcmp.eq.s32.totalorder %v3820_v25, %v220_v23  ;;  %vm287_vm14 = vcmp.eq.s32.totalorder %v3820_v25, %v217_v62  ;;  %2860 = vmatprep.mubr.f32.mxu1 %v613_v7  ;;  %3055 = vmatprep.mubr.f32.mxu0 %v631_v8  ;;  %v642_v39 = vsub.f32 %v3919_v58, %v641_v15 }
  0xb6   : > { %4520 = vst [vmem:[#allocation9_spill] sm:$0xff] %v3943_v20  ;;  %4521 = vst [vmem:[#allocation10_spill] sm:$0xff] %v3945_v22  ;;  %v3952_v17 = vsel %vm288_vm13, 1.0, %v4490_v45  ;;  %v3955_v33 = vsel %vm287_vm14, 1.0, %v4490_v45  ;;  %v633_v37 = vand.u32 4294901760, %v632_v28  ;;  %v651_v26 = vand.u32 4294901760, %v3945_v22  ;;  %3246 = vmatpush3.bf16.msra.mxu1 %v3798_v21  ;;  %3296 = vmatprep.subr.bf16.mxu0 %v3808_v35 }
  0xb7   : > { %v420_v42 = vsel %vm379_vm0, %v3952_v17, 0  ;;  %v417_v43 = vsel %vm379_vm0, %v3955_v33, 0  ;;  %v661_v46 = vand.u32 4294901760, %v3943_v20  ;;  %3248 = vmatprep.subr.bf16.mxu1 %v3810_v38  ;;  %3298 = vmatpush3.bf16.msra.mxu0 %v3808_v35  ;;  %v643_v56 = vand.u32 4294901760, %v642_v39 }
  0xb8   : > { %v3967_v51 = vsub.f32 %v420_v42, %v420_v42  ;;  %v3969_v54 = vsub.f32 %v417_v43, %v417_v43  ;;  %v226_v44 = vpop.permute.xlu1 %225  ;;  %2861 = vmatmul.mubr.f32.gmra.mrb[6].mxu1 %v623_v29  ;;  %3056 = vmatmul.mubr.f32.gmra.mrb[8].mxu0 %v641_v15  ;;  %v223_v21 = vpop.permute.xlu0 %222  ;;  %v652_v55 = vsub.f32 %v3945_v22, %v651_v26 }
  0xb9   : > { %vm290_vm15 = vcmp.eq.s32.totalorder %v3820_v25, %v226_v44  ;;  %vm289_vm1 = vcmp.eq.s32.totalorder %v3820_v25, %v223_v21  ;;  %2863 = vmatprep.mubr.f32.mxu1 %v633_v37  ;;  %3058 = vmatprep.mubr.f32.mxu0 %v651_v26  ;;  %v662_v63 = vsub.f32 %v3943_v20, %v661_v46 }
  0xba   : > { %4522 = vst [vmem:[#allocation11_spill] sm:$0xff] %v3967_v51  ;;  %4523 = vst [vmem:[#allocation12_spill] sm:$0xff] %v3969_v54  ;;  %v3976_v35 = vsel %vm290_vm15, 1.0, %v4490_v45  ;;  %v3979_v0 = vsel %vm289_vm1, 1.0, %v4490_v45  ;;  %v653_v3 = vand.u32 4294901760, %v652_v55  ;;  %v671_v4 = vand.u32 4294901760, %v3969_v54  ;;  %3250 = vmatpush3.bf16.msra.mxu1 %v3810_v38  ;;  %3300 = vmatprep.subr.bf16.mxu0 %v3671_v9 }
  0xbb   : > { %v426_v5 = vsel %vm379_vm0, %v3976_v35, 0  ;;  %v423_v7 = vsel %vm379_vm0, %v3979_v0, 0  ;;  %v681_v8 = vand.u32 4294901760, %v3967_v51  ;;  %3252 = vmatprep.subr.bf16.mxu1 %v3814_v40  ;;  %v663_v62 = vand.u32 4294901760, %v662_v63 }
  0xbc   : > { %v3990_v18 = vsub.f32 %v426_v5, %v426_v5  ;;  %v3992_v11 = vsub.f32 %v423_v7, %v423_v7  ;;  %v232_v15 = vpop.permute.xlu1 %231  ;;  %2864 = vmatmul.mubr.f32.gmra.mrb[8].mxu1 %v643_v56  ;;  %3059 = vmatmul.mubr.f32.gmra.mrb[10].mxu0 %v661_v46  ;;  %v229_v38 = vpop.permute.xlu0 %228  ;;  %v672_v23 = vsub.f32 %v3969_v54, %v671_v4 }
  0xbd   : > { %vm292_vm2 = vcmp.eq.s32.totalorder %v3820_v25, %v232_v15  ;;  %vm291_vm3 = vcmp.eq.s32.totalorder %v3820_v25, %v229_v38  ;;  %2866 = vmatprep.mubr.f32.mxu1 %v653_v3  ;;  %3061 = vmatprep.mubr.f32.mxu0 %v671_v4  ;;  %v682_v28 = vsub.f32 %v3967_v51, %v681_v8 }
  0xbe   : > { %4524 = vst [vmem:[#allocation13_spill] sm:$0xff] %v3990_v18  ;;  %4525 = vst [vmem:[#allocation14_spill] sm:$0xff] %v3992_v11  ;;  %v3999_v29 = vsel %vm292_vm2, 1.0, %v4490_v45  ;;  %v4002_v39 = vsel %vm291_vm3, 1.0, %v4490_v45  ;;  %v673_v37 = vand.u32 4294901760, %v672_v23  ;;  %v691_v26 = vand.u32 4294901760, %v3992_v11 }
  0xbf   : > { %v432_v42 = vsel %vm379_vm0, %v3999_v29, 0  ;;  %v429_v43 = vsel %vm379_vm0, %v4002_v39, 0  ;;  %v701_v46 = vand.u32 4294901760, %v3990_v18  ;;  %v683_v3 = vand.u32 4294901760, %v682_v28 }
  0xc0   : > { %v4010_v44 = vsub.f32 %v432_v42, %v432_v42  ;;  %v4012_v21 = vsub.f32 %v429_v43, %v429_v43  ;;  %v238_v55 = vpop.permute.xlu1 %237  ;;  %2867 = vmatmul.mubr.f32.gmra.mrb[10].mxu1 %v663_v62  ;;  %3062 = vmatmul.mubr.f32.gmra.mrb[12].mxu0 %v681_v8  ;;  %v235_v56 = vpop.permute.xlu0 %234  ;;  %v692_v63 = vsub.f32 %v3992_v11, %v691_v26 }
  0xc1   : > { %vm294_vm4 = vcmp.eq.s32.totalorder %v3820_v25, %v238_v55  ;;  %vm293_vm5 = vcmp.eq.s32.totalorder %v3820_v25, %v235_v56  ;;  %2869 = vmatprep.mubr.f32.mxu1 %v673_v37  ;;  %3064 = vmatprep.mubr.f32.mxu0 %v691_v26  ;;  %v702_v4 = vsub.f32 %v3990_v18, %v701_v46  ;;  %v4532_v18 = vmov 0.0  }
  0xc2   : > { %4526 = vst [vmem:[#allocation15_spill] sm:$0xff] %v4010_v44  ;;  %4527 = vst [vmem:[#allocation16_spill] sm:$0xff] %v4012_v21  ;;  %v4019_v5 = vsel %vm294_vm4, 1.0, %v4490_v45  ;;  %v4022_v7 = vsel %vm293_vm5, 1.0, %v4490_v45  ;;  %v693_v15 = vand.u32 4294901760, %v692_v63  ;;  %v711_v8 = vand.u32 4294901760, %v4012_v21 }
  0xc3   : > { %v438_v38 = vsel %vm379_vm0, %v4019_v5, 0  ;;  %v435_v23 = vsel %vm379_vm0, %v4022_v7, 0  ;;  %v721_v62 = vand.u32 4294901760, %v4010_v44  ;;  %v703_v55 = vand.u32 4294901760, %v702_v4 }
  0xc4   : > { %v4030_v28 = vsub.f32 %v438_v38, %v438_v38  ;;  %v4032_v37 = vsub.f32 %v435_v23, %v435_v23  ;;  %v244_v26 = vpop.permute.xlu1 %243  ;;  %2870 = vmatmul.mubr.f32.gmra.mrb[12].mxu1 %v683_v3  ;;  %3065 = vmatmul.mubr.f32.gmra.mrb[14].mxu0 %v701_v46  ;;  %v241_v42 = vpop.permute.xlu0 %240  ;;  %v712_v43 = vsub.f32 %v4012_v21, %v711_v8 }
  0xc5   : > { %vm296_vm6 = vcmp.eq.s32.totalorder %v3820_v25, %v244_v26  ;;  %vm295_vm7 = vcmp.eq.s32.totalorder %v3820_v25, %v241_v42  ;;  %2872 = vmatprep.mubr.f32.mxu1 %v693_v15  ;;  %3067 = vmatprep.mubr.f32.mxu0 %v711_v8  ;;  %v722_v56 = vsub.f32 %v4010_v44, %v721_v62 }
  0xc6   : > { %4528 = vst [vmem:[#allocation17_spill] sm:$0xff] %v4030_v28  ;;  %4529 = vst [vmem:[#allocation18_spill] sm:$0xff] %v4032_v37  ;;  %v4039_v63 = vsel %vm296_vm6, 1.0, %v4490_v45  ;;  %v4042_v38 = vsel %vm295_vm7, 1.0, %v4490_v45  ;;  %v713_v3 = vand.u32 4294901760, %v712_v43  ;;  %v731_v46 = vand.u32 4294901760, %v4032_v37 }
  0xc7   : > { %v444_v23 = vsel %vm379_vm0, %v4039_v63, 0  ;;  %v441_v26 = vsel %vm379_vm0, %v4042_v38, 0  ;;  %v741_v15 = vand.u32 4294901760, %v4030_v28  ;;  %v723_v44 = vand.u32 4294901760, %v722_v56 }
  0xc8   : > { %v4050_v4 = vsub.f32 %v444_v23, %v444_v23  ;;  %v4052_v8 = vsub.f32 %v441_v26, %v441_v26  ;;  %v250_v42 = vpop.permute.xlu1 %249  ;;  %2873 = vmatmul.mubr.f32.gmra.mrb[14].mxu1 %v703_v55  ;;  %3068 = vmatmul.mubr.f32.gmra.mrb[16].mxu0 %v721_v62  ;;  %v247_v45 = vpop.permute.xlu0 %246  ;;  %v732_v43 = vsub.f32 %v4032_v37, %v731_v46 }
  0xc9   : > { %vm298_vm8 = vcmp.eq.s32.totalorder %v3820_v25, %v250_v42  ;;  %vm297_vm9 = vcmp.eq.s32.totalorder %v3820_v25, %v247_v45  ;;  %2875 = vmatprep.mubr.f32.mxu1 %v713_v3  ;;  %3070 = vmatprep.mubr.f32.mxu0 %v731_v46  ;;  %v742_v21 = vsub.f32 %v4030_v28, %v741_v15 }
  0xca   : > { %4530 = vst [vmem:[#allocation19_spill] sm:$0xff] %v4050_v4  ;;  %4531 = vst [vmem:[#allocation20_spill] sm:$0xff] %v4052_v8  ;;  %v4059_v23 = vsel %vm298_vm8, 1.0, %v4532_v18  ;;  %v4062_v26 = vsel %vm297_vm9, 1.0, %v4532_v18  ;;  %v733_v55 = vand.u32 4294901760, %v732_v43  ;;  %v751_v62 = vand.u32 4294901760, %v4052_v8 }
  0xcb   : > { %v450_v37 = vsel %vm379_vm0, %v4059_v23, 0  ;;  %v447_v45 = vsel %vm379_vm0, %v4062_v26, 0  ;;  %v761_v3 = vand.u32 4294901760, %v4050_v4  ;;  %v743_v11 = vand.u32 4294901760, %v742_v21 }
  0xcc   : > { %v4070_v56 = vsub.f32 %v450_v37, %v450_v37  ;;  %v4072_v46 = vsub.f32 %v447_v45, %v447_v45  ;;  %v256_v42 = vpop.permute.xlu1 %255  ;;  %2876 = vmatmul.mubr.f32.gmra.mrb[16].mxu1 %v723_v44  ;;  %3071 = vmatmul.mubr.f32.gmra.mrb[18].mxu0 %v741_v15  ;;  %v253_v28 = vpop.permute.xlu0 %252  ;;  %v752_v43 = vsub.f32 %v4052_v8, %v751_v62 }
  0xcd   : > { %vm300_vm10 = vcmp.eq.s32.totalorder %v3820_v25, %v256_v42  ;;  %vm299_vm11 = vcmp.eq.s32.totalorder %v3820_v25, %v253_v28  ;;  %2878 = vmatprep.mubr.f32.mxu1 %v733_v55  ;;  %3073 = vmatprep.mubr.f32.mxu0 %v751_v62  ;;  %v762_v51 = vsub.f32 %v4050_v4, %v761_v3 }
  0xce   : > { %4533 = vst [vmem:[#allocation21_spill] sm:$0xff] %v4070_v56  ;;  %4534 = vst [vmem:[#allocation22_spill] sm:$0xff] %v4072_v46  ;;  %v4079_v37 = vsel %vm300_vm10, 1.0, %v4532_v18  ;;  %v4082_v45 = vsel %vm299_vm11, 1.0, %v4532_v18  ;;  %v753_v44 = vand.u32 4294901760, %v752_v43  ;;  %v771_v15 = vand.u32 4294901760, %v4072_v46 }
  0xcf   : > { %v456_v8 = vsel %vm379_vm0, %v4079_v37, 0  ;;  %v453_v28 = vsel %vm379_vm0, %v4082_v45, 0  ;;  %v781_v55 = vand.u32 4294901760, %v4070_v56  ;;  %v763_v54 = vand.u32 4294901760, %v762_v51 }
  0xd0   : > { %v4090_v21 = vsub.f32 %v456_v8, %v456_v8  ;;  %v4092_v62 = vsub.f32 %v453_v28, %v453_v28  ;;  %v262_v42 = vpop.permute.xlu1 %261  ;;  %2879 = vmatmul.mubr.f32.gmra.mrb[18].mxu1 %v743_v11  ;;  %3074 = vmatmul.mubr.f32.gmra.mrb[20].mxu0 %v761_v3  ;;  %v259_v4 = vpop.permute.xlu0 %258  ;;  %v772_v43 = vsub.f32 %v4072_v46, %v771_v15 }
  0xd1   : > { %vm302_vm12 = vcmp.eq.s32.totalorder %v3820_v25, %v262_v42  ;;  %vm301_vm13 = vcmp.eq.s32.totalorder %v3820_v25, %v259_v4  ;;  %2881 = vmatprep.mubr.f32.mxu1 %v753_v44  ;;  %3076 = vmatprep.mubr.f32.mxu0 %v771_v15  ;;  %v782_v20 = vsub.f32 %v4070_v56, %v781_v55 }
  0xd2   : > { %4535 = vst [vmem:[#allocation23_spill] sm:$0xff] %v4090_v21  ;;  %4536 = vst [vmem:[#allocation24_spill] sm:$0xff] %v4092_v62  ;;  %v4099_v8 = vsel %vm302_vm12, 1.0, %v4532_v18  ;;  %v4102_v28 = vsel %vm301_vm13, 1.0, %v4532_v18  ;;  %v773_v11 = vand.u32 4294901760, %v772_v43  ;;  %v791_v3 = vand.u32 4294901760, %v4092_v62 }
  0xd3   : > { %v462_v46 = vsel %vm379_vm0, %v4099_v8, 0  ;;  %v459_v4 = vsel %vm379_vm0, %v4102_v28, 0  ;;  %v801_v44 = vand.u32 4294901760, %v4090_v21  ;;  %v783_v22 = vand.u32 4294901760, %v782_v20 }
  0xd4   : > { %v4110_v51 = vsub.f32 %v462_v46, %v462_v46  ;;  %v4112_v15 = vsub.f32 %v459_v4, %v459_v4  ;;  %v268_v42 = vpop.permute.xlu1 %267  ;;  %2882 = vmatmul.mubr.f32.gmra.mrb[20].mxu1 %v763_v54  ;;  %3077 = vmatmul.mubr.f32.gmra.mrb[22].mxu0 %v781_v55  ;;  %v265_v56 = vpop.permute.xlu0 %264  ;;  %v792_v43 = vsub.f32 %v4092_v62, %v791_v3 }
  0xd5   : > { %vm304_vm14 = vcmp.eq.s32.totalorder %v3820_v25, %v268_v42  ;;  %vm303_vm15 = vcmp.eq.s32.totalorder %v3820_v25, %v265_v56  ;;  %2884 = vmatprep.mubr.f32.mxu1 %v773_v11  ;;  %3079 = vmatprep.mubr.f32.mxu0 %v791_v3  ;;  %v802_v58 = vsub.f32 %v4090_v21, %v801_v44 }
  0xd6   : > { %4537 = vst [vmem:[#allocation25_spill] sm:$0xff] %v4110_v51  ;;  %4538 = vst [vmem:[#allocation26_spill] sm:$0xff] %v4112_v15  ;;  %v4119_v46 = vsel %vm304_vm14, 1.0, %v4532_v18  ;;  %v4122_v4 = vsel %vm303_vm15, 1.0, %v4532_v18  ;;  %v793_v54 = vand.u32 4294901760, %v792_v43  ;;  %v811_v55 = vand.u32 4294901760, %v4112_v15 }
  0xd7   : > { %v468_v62 = vsel %vm379_vm0, %v4119_v46, 0  ;;  %v465_v56 = vsel %vm379_vm0, %v4122_v4, 0  ;;  %v821_v11 = vand.u32 4294901760, %v4110_v51  ;;  %v803_v61 = vand.u32 4294901760, %v802_v58 }
  0xd8   : > { %v4130_v20 = vsub.f32 %v468_v62, %v468_v62  ;;  %v4132_v3 = vsub.f32 %v465_v56, %v465_v56  ;;  %v274_v42 = vpop.permute.xlu1 %273  ;;  %2885 = vmatmul.mubr.f32.gmra.mrb[22].mxu1 %v783_v22  ;;  %3080 = vmatmul.mubr.f32.gmra.mrb[24].mxu0 %v801_v44  ;;  %v271_v21 = vpop.permute.xlu0 %270  ;;  %v812_v43 = vsub.f32 %v4112_v15, %v811_v55 }
  0xd9   : > { %vm306_vm1 = vcmp.eq.s32.totalorder %v3820_v25, %v274_v42  ;;  %vm305_vm2 = vcmp.eq.s32.totalorder %v3820_v25, %v271_v21  ;;  %2887 = vmatprep.mubr.f32.mxu1 %v793_v54  ;;  %3082 = vmatprep.mubr.f32.mxu0 %v811_v55  ;;  %v822_v34 = vsub.f32 %v4110_v51, %v821_v11 }
  0xda   : > { %v4139_v62 = vsel %vm306_vm1, 1.0, %v4532_v18  ;;  %v4142_v56 = vsel %vm305_vm2, 1.0, %v4532_v18  ;;  %v813_v22 = vand.u32 4294901760, %v812_v43  ;;  %v831_v44 = vand.u32 4294901760, %v4132_v3 }
  0xdb   : > { %v474_v15 = vsel %vm379_vm0, %v4139_v62, 0  ;;  %v471_v25 = vsel %vm379_vm0, %v4142_v56, 0  ;;  %v841_v21 = vand.u32 4294901760, %v4130_v20  ;;  %v823_v55 = vand.u32 4294901760, %v822_v34 }
  0xdc   : > { %v4150_v58 = vsub.f32 %v474_v15, %v474_v15  ;;  %v4152_v54 = vsub.f32 %v471_v25, %v471_v25  ;;  %2888 = vmatmul.mubr.f32.gmra.mrb[24].mxu1 %v803_v61  ;;  %3083 = vmatmul.mubr.f32.gmra.mrb[26].mxu0 %v821_v11  ;;  %v832_v18 = vsub.f32 %v4132_v3, %v831_v44 }
  0xdd   : > { %2890 = vmatprep.mubr.f32.mxu1 %v813_v22  ;;  %3085 = vmatprep.mubr.f32.mxu0 %v831_v44  ;;  %v842_v51 = vsub.f32 %v4130_v20, %v841_v21 }
  0xde   : > { %v833_v42 = vand.u32 4294901760, %v832_v18  ;;  %v851_v43 = vand.u32 4294901760, %v4152_v54  ;;  %v861_v36 = vand.u32 4294901760, %v4150_v58 }
  0xdf   : > { %v843_v61 = vand.u32 4294901760, %v842_v51 }
  0xe0   : > { %2891 = vmatmul.mubr.f32.gmra.mrb[26].mxu1 %v823_v55  ;;  %3086 = vmatmul.mubr.f32.gmra.mrb[28].mxu0 %v841_v21  ;;  %v852_v15 = vsub.f32 %v4152_v54, %v851_v43  ;;  %v862_v25 = vsub.f32 %v4150_v58, %v861_v36 }
  0xe1   : > { %2893 = vmatprep.mubr.f32.mxu1 %v833_v42  ;;  %3088 = vmatprep.mubr.f32.mxu0 %v851_v43 }
  0xe2   : > { %v853_v11 = vand.u32 4294901760, %v852_v15  ;;  %v863_v34 = vand.u32 4294901760, %v862_v25 }
  0xe4   : > { %2894 = vmatmul.mubr.f32.gmra.mrb[28].mxu1 %v843_v61  ;;  %3089 = vmatmul.mubr.f32.gmra.mrb[30].mxu0 %v861_v36 }
  0xe5   : > { %2896 = vmatprep.mubr.f32.mxu1 %v853_v11  ;;  %3107 = vmatprep.mubr.msk.f32.mxu0 %vm379_vm0, %v3830_v32 }
  0xe8   : > { %2897 = vmatmul.mubr.f32.gmra.mrb[30].mxu1 %v863_v34  ;;  %3108 = vmatmul.mubr.msk.f32.vlgmr.msra.gmra.mrb[0].mxu0 %vm379_vm0, %v3846_v53 }
  0xe9   : > { %2915 = vmatprep.mubr.msk.f32.mxu1 %vm379_vm0, %v3830_v32  ;;  %3110 = vmatprep.mubr.msk.f32.mxu0 %vm379_vm0, %v3827_v31 }
  0xea   : > { %3302 = vmatpush3.bf16.msra.mxu0 %v3671_v9  ;;  %v4539_v9 = vld [vmem:[#allocation6_spill] sm:$0xff] }
  0xeb   : > { %3304 = vmatprep.subr.bf16.mxu0 %v3677_v10 }
  0xec   : > { %2916 = vmatmul.mubr.msk.f32.vlgmr.msra.gmra.mrb[0].mxu1 %vm379_vm0, %v3846_v53  ;;  %3111 = vmatmul.mubr.msk.f32.gmra.mrb[2].mxu0 %vm379_vm0, %v3843_v52 }
  0xed   : > { %3254 = vmatpush3.bf16.msra.mxu1 %v3814_v40  ;;  %2918 = vmatprep.mubr.msk.f32.mxu1 %vm379_vm0, %v3827_v31  ;;  %v4543_v40 = vld [vmem:[#allocation10_spill] sm:$0xff] }
  0xee   : > { %3113 = vmatprep.mubr.msk.f32.mxu0 %vm379_vm0, %v3865_v2  ;;  %3256 = vmatprep.subr.bf16.mxu1 %v3816_v41 }
  0xef   : > { %3306 = vmatpush3.bf16.msra.mxu0 %v3677_v10  ;;  %v4540_v10 = vld [vmem:[#allocation5_spill] sm:$0xff] }
  0xf0   : > { %2919 = vmatmul.mubr.msk.f32.gmra.mrb[2].mxu1 %vm379_vm0, %v3843_v52  ;;  %3114 = vmatmul.mubr.msk.f32.gmra.mrb[4].mxu0 %vm379_vm0, %v3862_v1 }
  0xf1   : > { %2921 = vmatprep.mubr.msk.f32.mxu1 %vm379_vm0, %v3865_v2  ;;  %3116 = vmatprep.mubr.msk.f32.mxu0 %vm379_vm0, %v3887_v16 }
  0xf2   : > { %3258 = vmatpush3.bf16.msra.mxu1 %v3816_v41  ;;  %3308 = vmatprep.subr.bf16.mxu0 %v3710_v19  ;;  %v4544_v41 = vld [vmem:[#allocation9_spill] sm:$0xff] }
  0xf3   : > { %3260 = vmatprep.subr.bf16.mxu1 %v3818_v24  ;;  %3310 = vmatpush3.bf16.msra.mxu0 %v3710_v19  ;;  %v4541_v19 = vld [vmem:[#allocation8_spill] sm:$0xff] }
  0xf4   : > { %2922 = vmatmul.mubr.msk.f32.gmra.mrb[4].mxu1 %vm379_vm0, %v3862_v1  ;;  %3117 = vmatmul.mubr.msk.f32.gmra.mrb[6].mxu0 %vm379_vm0, %v3884_v12 }
  0xf5   : > { %2924 = vmatprep.mubr.msk.f32.mxu1 %vm379_vm0, %v3887_v16  ;;  %3119 = vmatprep.mubr.msk.f32.mxu0 %vm379_vm0, %v3909_v50 }
  0xf6   : > { %3262 = vmatpush3.bf16.msra.mxu1 %v3818_v24  ;;  %3312 = vmatprep.subr.bf16.mxu0 %v3740_v30  ;;  %v4545_v24 = vld [vmem:[#allocation12_spill] sm:$0xff] }
  0xf7   : > { %3264 = vmatprep.subr.bf16.mxu1 %v3822_v27  ;;  %3314 = vmatpush3.bf16.msra.mxu0 %v3740_v30  ;;  %v4542_v30 = vld [vmem:[#allocation7_spill] sm:$0xff] }
  0xf8   : > { %2925 = vmatmul.mubr.msk.f32.gmra.mrb[6].mxu1 %vm379_vm0, %v3884_v12  ;;  %3120 = vmatmul.mubr.msk.f32.gmra.mrb[8].mxu0 %vm379_vm0, %v3906_v47 }
  0xf9   : > { %2927 = vmatprep.mubr.msk.f32.mxu1 %vm379_vm0, %v3909_v50  ;;  %3122 = vmatprep.mubr.msk.f32.mxu0 %vm379_vm0, %v3931_v6 }
  0xfa   : > { %3266 = vmatpush3.bf16.msra.mxu1 %v3822_v27  ;;  %v4546_v27 = vld [vmem:[#allocation11_spill] sm:$0xff] }
  0xfc   : > { %2928 = vmatmul.mubr.msk.f32.gmra.mrb[8].mxu1 %vm379_vm0, %v3906_v47  ;;  %3123 = vmatmul.mubr.msk.f32.gmra.mrb[10].mxu0 %vm379_vm0, %v3928_v57 }
  0xfd   : > { %2930 = vmatprep.mubr.msk.f32.mxu1 %vm379_vm0, %v3931_v6  ;;  %3125 = vmatprep.mubr.msk.f32.mxu0 %vm379_vm0, %v3955_v33 }
 0x100   : > { %2931 = vmatmul.mubr.msk.f32.gmra.mrb[10].mxu1 %vm379_vm0, %v3928_v57  ;;  %3126 = vmatmul.mubr.msk.f32.gmra.mrb[12].mxu0 %vm379_vm0, %v3952_v17 }
 0x101   : > { %2933 = vmatprep.mubr.msk.f32.mxu1 %vm379_vm0, %v3955_v33  ;;  %3128 = vmatprep.mubr.msk.f32.mxu0 %vm379_vm0, %v3979_v0 }
 0x104   : > { %2934 = vmatmul.mubr.msk.f32.gmra.mrb[12].mxu1 %vm379_vm0, %v3952_v17  ;;  %3129 = vmatmul.mubr.msk.f32.gmra.mrb[14].mxu0 %vm379_vm0, %v3976_v35 }
 0x105   : > { %2936 = vmatprep.mubr.msk.f32.mxu1 %vm379_vm0, %v3979_v0  ;;  %3131 = vmatprep.mubr.msk.f32.mxu0 %vm379_vm0, %v4002_v39 }
 0x108   : > { %2937 = vmatmul.mubr.msk.f32.gmra.mrb[14].mxu1 %vm379_vm0, %v3976_v35  ;;  %3132 = vmatmul.mubr.msk.f32.gmra.mrb[16].mxu0 %vm379_vm0, %v3999_v29 }
 0x109   : > { %2939 = vmatprep.mubr.msk.f32.mxu1 %vm379_vm0, %v4002_v39  ;;  %3134 = vmatprep.mubr.msk.f32.mxu0 %vm379_vm0, %v4022_v7 }
 0x10c   : > { %2940 = vmatmul.mubr.msk.f32.gmra.mrb[16].mxu1 %vm379_vm0, %v3999_v29  ;;  %3135 = vmatmul.mubr.msk.f32.gmra.mrb[18].mxu0 %vm379_vm0, %v4019_v5 }
 0x10d   : > { %2942 = vmatprep.mubr.msk.f32.mxu1 %vm379_vm0, %v4022_v7  ;;  %3137 = vmatprep.mubr.msk.f32.mxu0 %vm379_vm0, %v4042_v38 }
 0x110   : > { %2943 = vmatmul.mubr.msk.f32.gmra.mrb[18].mxu1 %vm379_vm0, %v4019_v5  ;;  %3138 = vmatmul.mubr.msk.f32.gmra.mrb[20].mxu0 %vm379_vm0, %v4039_v63 }
 0x111   : > { %2945 = vmatprep.mubr.msk.f32.mxu1 %vm379_vm0, %v4042_v38  ;;  %3140 = vmatprep.mubr.msk.f32.mxu0 %vm379_vm0, %v4062_v26 }
 0x114   : > { %2946 = vmatmul.mubr.msk.f32.gmra.mrb[20].mxu1 %vm379_vm0, %v4039_v63  ;;  %3141 = vmatmul.mubr.msk.f32.gmra.mrb[22].mxu0 %vm379_vm0, %v4059_v23 }
 0x115   : > { %2948 = vmatprep.mubr.msk.f32.mxu1 %vm379_vm0, %v4062_v26  ;;  %3143 = vmatprep.mubr.msk.f32.mxu0 %vm379_vm0, %v4082_v45 }
 0x118   : > { %2949 = vmatmul.mubr.msk.f32.gmra.mrb[22].mxu1 %vm379_vm0, %v4059_v23  ;;  %3144 = vmatmul.mubr.msk.f32.gmra.mrb[24].mxu0 %vm379_vm0, %v4079_v37 }
 0x119   : > { %2951 = vmatprep.mubr.msk.f32.mxu1 %vm379_vm0, %v4082_v45  ;;  %3146 = vmatprep.mubr.msk.f32.mxu0 %vm379_vm0, %v4102_v28 }
 0x11c   : > { %2952 = vmatmul.mubr.msk.f32.gmra.mrb[24].mxu1 %vm379_vm0, %v4079_v37  ;;  %3147 = vmatmul.mubr.msk.f32.gmra.mrb[26].mxu0 %vm379_vm0, %v4099_v8 }
 0x11d   : > { %2954 = vmatprep.mubr.msk.f32.mxu1 %vm379_vm0, %v4102_v28  ;;  %3149 = vmatprep.mubr.msk.f32.mxu0 %vm379_vm0, %v4122_v4 }
 0x120   : > { %2955 = vmatmul.mubr.msk.f32.gmra.mrb[26].mxu1 %vm379_vm0, %v4099_v8  ;;  %3150 = vmatmul.mubr.msk.f32.gmra.mrb[28].mxu0 %vm379_vm0, %v4119_v46 }
 0x121   : > { %2957 = vmatprep.mubr.msk.f32.mxu1 %vm379_vm0, %v4122_v4  ;;  %3152 = vmatprep.mubr.msk.f32.mxu0 %vm379_vm0, %v4142_v56 }
 0x124   : > { %2958 = vmatmul.mubr.msk.f32.gmra.mrb[28].mxu1 %vm379_vm0, %v4119_v46  ;;  %3153 = vmatmul.mubr.msk.f32.gmra.mrb[30].mxu0 %vm379_vm0, %v4139_v62 }
 0x125   : > { %2960 = vmatprep.mubr.msk.f32.mxu1 %vm379_vm0, %v4142_v56  ;;  %3171 = vmatprep.mubr.msk.f32.mxu0 %vm379_vm0, %v3830_v32  ;;  %v4548_v32 = vld [vmem:[#allocation13_spill] sm:$0xff] }
 0x128   : > { %2961 = vmatmul.mubr.msk.f32.gmra.mrb[30].mxu1 %vm379_vm0, %v4139_v62  ;;  %3172 = vmatmul.mubr.msk.f32.vlgmr.msra.gmra.mrb[0].mxu0 %vm379_vm0, %v3846_v53  ;;  %v4552_v53 = vld [vmem:[#allocation17_spill] sm:$0xff] }
 0x129   : > { %2979 = vmatprep.mubr.f32.mxu1 %v3838_v49  ;;  %3174 = vmatprep.mubr.msk.f32.mxu0 %vm379_vm0, %v3827_v31  ;;  %v4547_v31 = vld [vmem:[#allocation14_spill] sm:$0xff]  ;;  %v4550_v49 = vld [vmem:[#allocation15_spill] sm:$0xff] }
 0x12c   : > { %2980 = vmatmul.mubr.f32.vlgmr.msra.gmra.mrb[0].mxu1 %v3856_v60  ;;  %3175 = vmatmul.mubr.msk.f32.gmra.mrb[2].mxu0 %vm379_vm0, %v3843_v52  ;;  %v4551_v52 = vld [vmem:[#allocation18_spill] sm:$0xff]  ;;  %v4554_v60 = vld [vmem:[#allocation19_spill] sm:$0xff] }
 0x12d   : > { %2982 = vmatprep.mubr.f32.mxu1 %v3836_v48  ;;  %3177 = vmatprep.mubr.msk.f32.mxu0 %vm379_vm0, %v3865_v2  ;;  %v4549_v48 = vld [vmem:[#allocation16_spill] sm:$0xff]  ;;  %v4556_v2 = vld [vmem:[#allocation21_spill] sm:$0xff] }
 0x130   : > { %2983 = vmatmul.mubr.f32.gmra.mrb[2].mxu1 %v3854_v59  ;;  %3178 = vmatmul.mubr.msk.f32.gmra.mrb[4].mxu0 %vm379_vm0, %v3862_v1  ;;  %v4553_v59 = vld [vmem:[#allocation20_spill] sm:$0xff]  ;;  %v4555_v1 = vld [vmem:[#allocation22_spill] sm:$0xff] }
 0x131   : > { %2985 = vmatprep.mubr.f32.mxu1 %v3876_v14  ;;  %3180 = vmatprep.mubr.msk.f32.mxu0 %vm379_vm0, %v3887_v16  ;;  %v4558_v14 = vld [vmem:[#allocation23_spill] sm:$0xff]  ;;  %v4560_v16 = vld [vmem:[#allocation25_spill] sm:$0xff] }
 0x134   : > { %2986 = vmatmul.mubr.f32.gmra.mrb[4].mxu1 %v3874_v13  ;;  %3181 = vmatmul.mubr.msk.f32.gmra.mrb[6].mxu0 %vm379_vm0, %v3884_v12  ;;  %v4557_v13 = vld [vmem:[#allocation24_spill] sm:$0xff]  ;;  %v4559_v12 = vld [vmem:[#allocation26_spill] sm:$0xff] }
 0x135   : > { %2988 = vmatprep.mubr.f32.mxu1 %v4539_v9  ;;  %3183 = vmatprep.mubr.msk.f32.mxu0 %vm379_vm0, %v3909_v50 }
 0x138   : > { %2989 = vmatmul.mubr.f32.gmra.mrb[6].mxu1 %v4540_v10  ;;  %3184 = vmatmul.mubr.msk.f32.gmra.mrb[8].mxu0 %vm379_vm0, %v3906_v47 }
 0x139   : > { %2991 = vmatprep.mubr.f32.mxu1 %v4541_v19  ;;  %3186 = vmatprep.mubr.msk.f32.mxu0 %vm379_vm0, %v3931_v6 }
 0x13c   : > { %2992 = vmatmul.mubr.f32.gmra.mrb[8].mxu1 %v4542_v30  ;;  %3187 = vmatmul.mubr.msk.f32.gmra.mrb[10].mxu0 %vm379_vm0, %v3928_v57 }
 0x13d   : > { %2994 = vmatprep.mubr.f32.mxu1 %v4543_v40  ;;  %3189 = vmatprep.mubr.msk.f32.mxu0 %vm379_vm0, %v3955_v33 }
 0x140   : > { %2995 = vmatmul.mubr.f32.gmra.mrb[10].mxu1 %v4544_v41  ;;  %3190 = vmatmul.mubr.msk.f32.gmra.mrb[12].mxu0 %vm379_vm0, %v3952_v17 }
 0x141   : > { %2997 = vmatprep.mubr.f32.mxu1 %v4545_v24  ;;  %3192 = vmatprep.mubr.msk.f32.mxu0 %vm379_vm0, %v3979_v0 }
 0x144   : > { %2998 = vmatmul.mubr.f32.gmra.mrb[12].mxu1 %v4546_v27  ;;  %3193 = vmatmul.mubr.msk.f32.gmra.mrb[14].mxu0 %vm379_vm0, %v3976_v35 }
 0x145   : > { %3000 = vmatprep.mubr.f32.mxu1 %v4547_v31  ;;  %3195 = vmatprep.mubr.msk.f32.mxu0 %vm379_vm0, %v4002_v39 }
 0x148   : > { %3001 = vmatmul.mubr.f32.gmra.mrb[14].mxu1 %v4548_v32  ;;  %3196 = vmatmul.mubr.msk.f32.gmra.mrb[16].mxu0 %vm379_vm0, %v3999_v29 }
 0x149   : > { %3003 = vmatprep.mubr.f32.mxu1 %v4549_v48  ;;  %3198 = vmatprep.mubr.msk.f32.mxu0 %vm379_vm0, %v4022_v7 }
 0x14c   : > { %3004 = vmatmul.mubr.f32.gmra.mrb[16].mxu1 %v4550_v49  ;;  %3199 = vmatmul.mubr.msk.f32.gmra.mrb[18].mxu0 %vm379_vm0, %v4019_v5 }
 0x14d   : > { %3006 = vmatprep.mubr.f32.mxu1 %v4551_v52  ;;  %3201 = vmatprep.mubr.msk.f32.mxu0 %vm379_vm0, %v4042_v38 }
 0x150   : > { %3007 = vmatmul.mubr.f32.gmra.mrb[18].mxu1 %v4552_v53  ;;  %3202 = vmatmul.mubr.msk.f32.gmra.mrb[20].mxu0 %vm379_vm0, %v4039_v63 }
 0x151   : > { %3009 = vmatprep.mubr.f32.mxu1 %v4553_v59  ;;  %3204 = vmatprep.mubr.msk.f32.mxu0 %vm379_vm0, %v4062_v26 }
 0x154   : > { %3010 = vmatmul.mubr.f32.gmra.mrb[20].mxu1 %v4554_v60  ;;  %3205 = vmatmul.mubr.msk.f32.gmra.mrb[22].mxu0 %vm379_vm0, %v4059_v23 }
 0x155   : > { %3012 = vmatprep.mubr.f32.mxu1 %v4555_v1  ;;  %3207 = vmatprep.mubr.msk.f32.mxu0 %vm379_vm0, %v4082_v45 }
 0x158   : > { %3013 = vmatmul.mubr.f32.gmra.mrb[22].mxu1 %v4556_v2  ;;  %3208 = vmatmul.mubr.msk.f32.gmra.mrb[24].mxu0 %vm379_vm0, %v4079_v37 }
 0x159   : > { %3015 = vmatprep.mubr.f32.mxu1 %v4557_v13  ;;  %3210 = vmatprep.mubr.msk.f32.mxu0 %vm379_vm0, %v4102_v28 }
 0x15c   : > { %3016 = vmatmul.mubr.f32.gmra.mrb[24].mxu1 %v4558_v14  ;;  %3211 = vmatmul.mubr.msk.f32.gmra.mrb[26].mxu0 %vm379_vm0, %v4099_v8 }
 0x15d   : > { %3018 = vmatprep.mubr.f32.mxu1 %v4559_v12  ;;  %3213 = vmatprep.mubr.msk.f32.mxu0 %vm379_vm0, %v4122_v4 }
 0x160   : > { %3019 = vmatmul.mubr.f32.gmra.mrb[26].mxu1 %v4560_v16  ;;  %3214 = vmatmul.mubr.msk.f32.gmra.mrb[28].mxu0 %vm379_vm0, %v4119_v46 }
 0x161   : > { %3021 = vmatprep.mubr.f32.mxu1 %v4132_v3  ;;  %3216 = vmatprep.mubr.msk.f32.mxu0 %vm379_vm0, %v4142_v56 }
 0x164   : > { %3022 = vmatmul.mubr.f32.gmra.mrb[28].mxu1 %v4130_v20  ;;  %3217 = vmatmul.mubr.msk.f32.gmra.mrb[30].mxu0 %vm379_vm0, %v4139_v62 }
 0x165   : > { %3024 = vmatprep.mubr.f32.mxu1 %v4152_v54 }
 0x168   : > { %3025 = vmatmul.mubr.f32.gmra.mrb[30].mxu1 %v4150_v58 }
 0x1fb   : > { %v3173_v36 = vpop.f32.mrb[0].mxu0 }
 0x1fc   : > { %v2156_v47 = vpop.f32.mrb[1].mxu0 }
 0x1ff   : > { %v2981_v50 = vpop.f32.mrb[0].mxu1  ;;  %v3176_v57 = vpop.f32.mrb[2].mxu0 }
 0x200   : > { %v3315_v6 = vadd.f32 %v3173_v36, %v2981_v50  ;;  %v1250_v17 = vpop.f32.mrb[1].mxu1  ;;  %v2168_v33 = vpop.f32.mrb[3].mxu0 }
 0x201   : > { %v3316_v35 = vadd.f32 %v2156_v47, %v1250_v17 }
 0x202   : > { %2347 = vst [vmem:[%s4401_s25 + $0x8] sm:$0xff] %v3315_v6 }
 0x203   : > { %2346 = vst [vmem:[%s4401_s25] sm:$0xff] %v3316_v35  ;;  %v2984_v0 = vpop.f32.mrb[2].mxu1  ;;  %v3179_v29 = vpop.f32.mrb[4].mxu0 }
 0x204   : > { %v3317_v39 = vadd.f32 %v3176_v57, %v2984_v0  ;;  %v1264_v5 = vpop.f32.mrb[3].mxu1  ;;  %v2180_v7 = vpop.f32.mrb[5].mxu0 }
 0x205   : > { %v3318_v63 = vadd.f32 %v2168_v33, %v1264_v5 }
 0x206   : > { %2349 = vst [vmem:[%s4401_s25 + $0x18] sm:$0xff] %v3317_v39 }
 0x207   : > { %2348 = vst [vmem:[%s4401_s25 + $0x10] sm:$0xff] %v3318_v63  ;;  %v2987_v38 = vpop.f32.mrb[4].mxu1  ;;  %v3182_v23 = vpop.f32.mrb[6].mxu0 }
 0x208   : > { %v3319_v26 = vadd.f32 %v3179_v29, %v2987_v38  ;;  %v1278_v37 = vpop.f32.mrb[5].mxu1  ;;  %v2192_v45 = vpop.f32.mrb[7].mxu0 }
 0x209   : > { %v3320_v8 = vadd.f32 %v2180_v7, %v1278_v37 }
 0x20a   : > { %2351 = vst [vmem:[%s4401_s25 + $0x28] sm:$0xff] %v3319_v26 }
 0x20b   : > { %2350 = vst [vmem:[%s4401_s25 + $0x20] sm:$0xff] %v3320_v8  ;;  %v2990_v28 = vpop.f32.mrb[6].mxu1  ;;  %v3185_v51 = vpop.f32.mrb[8].mxu0 }
 0x20c   : > { %v3321_v46 = vadd.f32 %v3182_v23, %v2990_v28  ;;  %v1292_v4 = vpop.f32.mrb[7].mxu1  ;;  %v2204_v20 = vpop.f32.mrb[9].mxu0 }
 0x20d   : > { %v3322_v3 = vadd.f32 %v2192_v45, %v1292_v4 }
 0x20e   : > { %2353 = vst [vmem:[%s4401_s25 + $0x38] sm:$0xff] %v3321_v46 }
 0x20f   : > { %2352 = vst [vmem:[%s4401_s25 + $0x30] sm:$0xff] %v3322_v3  ;;  %v2993_v62 = vpop.f32.mrb[8].mxu1  ;;  %v3188_v56 = vpop.f32.mrb[10].mxu0 }
 0x210   : > { %v3323_v22 = vadd.f32 %v3185_v51, %v2993_v62  ;;  %v1306_v44 = vpop.f32.mrb[9].mxu1  ;;  %v2216_v21 = vpop.f32.mrb[11].mxu0 }
 0x211   : > { %v3324_v58 = vadd.f32 %v2204_v20, %v1306_v44 }
 0x212   : > { %2355 = vst [vmem:[%s4401_s25 + $0x48] sm:$0xff] %v3323_v22 }
 0x213   : > { %2354 = vst [vmem:[%s4401_s25 + $0x40] sm:$0xff] %v3324_v58  ;;  %v2996_v54 = vpop.f32.mrb[10].mxu1  ;;  %v3191_v18 = vpop.f32.mrb[12].mxu0 }
 0x214   : > { %v3325_v55 = vadd.f32 %v3188_v56, %v2996_v54  ;;  %v1320_v42 = vpop.f32.mrb[11].mxu1  ;;  %v2228_v43 = vpop.f32.mrb[13].mxu0 }
 0x215   : > { %v3326_v15 = vadd.f32 %v2216_v21, %v1320_v42 }
 0x216   : > { %2357 = vst [vmem:[%s4401_s25 + $0x58] sm:$0xff] %v3325_v55 }
 0x217   : > { %2356 = vst [vmem:[%s4401_s25 + $0x50] sm:$0xff] %v3326_v15  ;;  %v2999_v61 = vpop.f32.mrb[12].mxu1  ;;  %v3194_v11 = vpop.f32.mrb[14].mxu0 }
 0x218   : > { %v3327_v25 = vadd.f32 %v3191_v18, %v2999_v61  ;;  %v1334_v34 = vpop.f32.mrb[13].mxu1  ;;  %v2240_v9 = vpop.f32.mrb[15].mxu0 }
 0x219   : > { %v3328_v10 = vadd.f32 %v2228_v43, %v1334_v34 }
 0x21a   : > { %2359 = vst [vmem:[%s4401_s25 + $0x68] sm:$0xff] %v3327_v25 }
 0x21b   : > { %2358 = vst [vmem:[%s4401_s25 + $0x60] sm:$0xff] %v3328_v10  ;;  %v3002_v19 = vpop.f32.mrb[14].mxu1  ;;  %v3197_v30 = vpop.f32.mrb[16].mxu0 }
 0x21c   : > { %v3329_v40 = vadd.f32 %v3194_v11, %v3002_v19  ;;  %v1348_v41 = vpop.f32.mrb[15].mxu1  ;;  %v2252_v24 = vpop.f32.mrb[17].mxu0 }
 0x21d   : > { %v3330_v27 = vadd.f32 %v2240_v9, %v1348_v41 }
 0x21e   : > { %2361 = vst [vmem:[%s4401_s25 + $0x78] sm:$0xff] %v3329_v40 }
 0x21f   : > { %2360 = vst [vmem:[%s4401_s25 + $0x70] sm:$0xff] %v3330_v27  ;;  %v3005_v31 = vpop.f32.mrb[16].mxu1  ;;  %v3200_v32 = vpop.f32.mrb[18].mxu0 }
 0x220   : > { %v3331_v48 = vadd.f32 %v3197_v30, %v3005_v31  ;;  %v1362_v49 = vpop.f32.mrb[17].mxu1  ;;  %v2264_v52 = vpop.f32.mrb[19].mxu0 }
 0x221   : > { %v3332_v53 = vadd.f32 %v2252_v24, %v1362_v49 }
 0x222   : > { %2363 = vst [vmem:[%s4401_s25 + $0x88] sm:$0xff] %v3331_v48 }
 0x223   : > { %2362 = vst [vmem:[%s4401_s25 + $0x80] sm:$0xff] %v3332_v53  ;;  %v3008_v59 = vpop.f32.mrb[18].mxu1  ;;  %v3203_v60 = vpop.f32.mrb[20].mxu0 }
 0x224   : > { %v3333_v1 = vadd.f32 %v3200_v32, %v3008_v59  ;;  %v1376_v2 = vpop.f32.mrb[19].mxu1  ;;  %v2276_v13 = vpop.f32.mrb[21].mxu0 }
 0x225   : > { %v3334_v14 = vadd.f32 %v2264_v52, %v1376_v2 }
 0x226   : > { %2365 = vst [vmem:[%s4401_s25 + $0x98] sm:$0xff] %v3333_v1 }
 0x227   : > { %2364 = vst [vmem:[%s4401_s25 + $0x90] sm:$0xff] %v3334_v14  ;;  %v3011_v12 = vpop.f32.mrb[20].mxu1  ;;  %v3206_v16 = vpop.f32.mrb[22].mxu0 }
 0x228   : > { %v3335_v36 = vadd.f32 %v3203_v60, %v3011_v12  ;;  %v1390_v47 = vpop.f32.mrb[21].mxu1  ;;  %v2288_v50 = vpop.f32.mrb[23].mxu0 }
 0x229   : > { %v3336_v57 = vadd.f32 %v2276_v13, %v1390_v47 }
 0x22a   : > { %2367 = vst [vmem:[%s4401_s25 + $0xa8] sm:$0xff] %v3335_v36 }
 0x22b   : > { %2366 = vst [vmem:[%s4401_s25 + $0xa0] sm:$0xff] %v3336_v57  ;;  %v3014_v6 = vpop.f32.mrb[22].mxu1  ;;  %v3209_v17 = vpop.f32.mrb[24].mxu0 }
 0x22c   : > { %v3337_v33 = vadd.f32 %v3206_v16, %v3014_v6  ;;  %v1404_v35 = vpop.f32.mrb[23].mxu1  ;;  %v2300_v0 = vpop.f32.mrb[25].mxu0 }
 0x22d   : > { %v3338_v29 = vadd.f32 %v2288_v50, %v1404_v35 }
 0x22e   : > { %2369 = vst [vmem:[%s4401_s25 + $0xb8] sm:$0xff] %v3337_v33 }
 0x22f   : > { %2368 = vst [vmem:[%s4401_s25 + $0xb0] sm:$0xff] %v3338_v29  ;;  %v3017_v39 = vpop.f32.mrb[24].mxu1  ;;  %v3212_v5 = vpop.f32.mrb[26].mxu0 }
 0x230   : > { %v3339_v7 = vadd.f32 %v3209_v17, %v3017_v39  ;;  %v1418_v63 = vpop.f32.mrb[25].mxu1  ;;  %v2312_v38 = vpop.f32.mrb[27].mxu0 }
 0x231   : > { %v3340_v23 = vadd.f32 %v2300_v0, %v1418_v63 }
 0x232   : > { %2371 = vst [vmem:[%s4401_s25 + $0xc8] sm:$0xff] %v3339_v7 }
 0x233   : > { %2370 = vst [vmem:[%s4401_s25 + $0xc0] sm:$0xff] %v3340_v23  ;;  %v3020_v26 = vpop.f32.mrb[26].mxu1  ;;  %v3215_v37 = vpop.f32.mrb[28].mxu0 }
 0x234   : > { %v3341_v45 = vadd.f32 %v3212_v5, %v3020_v26  ;;  %v1432_v8 = vpop.f32.mrb[27].mxu1  ;;  %v2324_v28 = vpop.f32.mrb[29].mxu0 }
 0x235   : > { %v3342_v51 = vadd.f32 %v2312_v38, %v1432_v8 }
 0x236   : > { %2373 = vst [vmem:[%s4401_s25 + $0xd8] sm:$0xff] %v3341_v45 }
 0x237   : > { %2372 = vst [vmem:[%s4401_s25 + $0xd0] sm:$0xff] %v3342_v51  ;;  %v3023_v46 = vpop.f32.mrb[28].mxu1  ;;  %v3218_v4 = vpop.f32.mrb[30].mxu0 }
 0x238   : > { %v3343_v20 = vadd.f32 %v3215_v37, %v3023_v46  ;;  %v1446_v3 = vpop.f32.mrb[29].mxu1  ;;  %v2336_v62 = vpop.f32.mrb[31].mxu0 }
 0x239   : > { %v3344_v56 = vadd.f32 %v2324_v28, %v1446_v3 }
 0x23a   : > { %2375 = vst [vmem:[%s4401_s25 + $0xe8] sm:$0xff] %v3343_v20 }
 0x23b   : > { %2374 = vst [vmem:[%s4401_s25 + $0xe0] sm:$0xff] %v3344_v56  ;;  %v3026_v22 = vpop.f32.mrb[30].mxu1 }
 0x23c   : > { %v3345_v44 = vadd.f32 %v3218_v4, %v3026_v22  ;;  %v1460_v21 = vpop.f32.mrb[31].mxu1 }
 0x23d   : > { %v3346_v58 = vadd.f32 %v2336_v62, %v1460_v21 }
 0x23e   : > { %2377 = vst [vmem:[%s4401_s25 + $0xf8] sm:$0xff] %v3345_v44 }
 0x23f   : > { %2376 = vst [vmem:[%s4401_s25 + $0xf0] sm:$0xff] %v3346_v58 }
 0x240   : > { %3533 = shalt.err (!%p3530_p3)
}
 0x241   : > { %s3534_s7 = scalar_lea.hbm %s4438_s30, 4096  ;;  %s3538_s16 = scalar_lea.hbm %s4489_s2, 8192 }
 0x242   : > { %p3535_p4 = scmp.ne.s32.totalorder %s4438_s30, %s3534_s7  ;;  %p3539_p9 = scmp.lt.u32.totalorder %s4438_s30, %s4489_s2 }
 0x243   : > { %p3540_p10 = scmp.lt.u32.totalorder %s3538_s16, %s3534_s7  ;;  %p3542_p12 = scmp.lt.u32.totalorder %s3534_s7, %s4438_s30 }
 0x244   : > { %p3536_p7 = pnand %p3535_p4, %p3642_p5 }
 0x245   : > { %p3541_p11 = por %p3540_p10, %p3539_p9 }
 0x246   : > { %p3537_p8 = pneg %p3536_p7 }
 0x247   : > { %p3543_p13 = por %p3542_p12, %p3541_p11 }
 0x249   : > { %p3544_p0 = pnand %p3543_p13, %p3537_p8 }
 0x24b   : > { %3547 = shalt.err (!%p3544_p0)
}
 0x24c   : > { %s3587_s22 = smov 128   ;;  %s3588_s23 = smov 8  }
 0x24d   : > { %3475 = dma.vmem_to_hbm [thread:$0]  (%p3642_p5), %s4440_s27, 4096, %s4438_s30, %s4446_s13, %s3587_s22, %s3587_s22, %s3588_s23  }
 0x24e PF: > { %p3481_p1 = scmp.ge.s32.totalorder %s3582_s12, 2  ;;  %s2407_s24 = sand.u32 1, %s3570_s9  }
 0x24f   : > { %s2408_s25 = scalar_lea.sflag [#allocation3], %s2407_s24 }
 0x250   : > { %p3478_p2 = pnand %p3481_p1, %p3646_p6 }
 0x252   : > { %3565 = dma.done.wait (!%p3478_p2), %s2408_s25, 4096  }
 0x253   : > { %3567 = vsyncadd (!%p3478_p2), %s2408_s25, 4294963200  ;;  %p12_p3 = scmp.ge.s32.totalorder %s3629_s15, 4   ;;  %s4561_s9 = smov %s3574_s10 }
 0x254   : > { %s4562_s10 = smov %s3578_s11  ;;  %s4563_s11 = smov %s3640_s18 }
 0x255   : > { %s4564_s12 = smov %s3629_s15  ;;  %14 = sbr.rel (!%p12_p3) target bundleno = 3 (0x3), region = 63 }
 0x25c   :  { %2413 = vsyncpa [#allocation3], 1 }
 0x25d   :  { %2415 = vsyncpa [#allocation3 + $0x1], 1 }

</bundles_post_ra>
